<compile_context>
chip_gen: v6e
topology: v6e:2x2x1
jax: 0.10.0
libtpu: 0.0.40
codegen_flags: <defaults>
</compile_context>

<pallas_src>
import functools

import jax
import jax.numpy as jnp
from jax.experimental import pallas as pl
from jax.experimental.pallas import tpu as pltpu


# Safe on all generations: < 64 MiB physical VMEM on v7x, well under the
# 128 MiB of v5e/v6e, above the 16/32 MiB scoped defaults.
_VMEM_LIMIT = 48 * 1024 * 1024


# ----------------------------------------------------------------------------
# Tile picking / padding helpers
# ----------------------------------------------------------------------------
def _round_up(x, m):
    return ((x + m - 1) // m) * m


def _aligned_divisor(dim, pref, align):
    t = min(pref, dim)
    t -= t % align
    while t >= align:
        if dim % t == 0:
            return t
        t -= align
    return None


def _tile(dim, pref, align):
    """Return (tile, padded_dim): tile divides padded_dim and is either a
    multiple of `align` or the full (unpadded) extent.  Large awkward dims are
    padded instead of silently becoming one giant block."""
    if dim % align == 0:
        t = _aligned_divisor(dim, pref, align)
        return (t if t is not None else dim), dim
    if dim <= max(pref, align):
        return dim, dim                      # single full-extent block: legal
    padded = _round_up(dim, align)
    t = _aligned_divisor(padded, pref, align)
    return (t if t is not None else align), padded


def _seq_tile(seq, pref):
    """Sequence tile: divides seq and is a multiple of 8, else full seq."""
    if seq <= pref:
        return seq
    t = pref - (pref % 8)
    while t >= 8:
        if seq % t == 0:
            return t
        t -= 8
    return seq


# ----------------------------------------------------------------------------
# Tiled Pallas linear kernel:  y = x @ w_t + b   (torch Linear: y = x @ W.T + b)
# ----------------------------------------------------------------------------
def _linear_kernel(x_ref, wt_ref, b_ref, o_ref, acc_ref):
    @pl.when(pl.program_id(2) == 0)
    def _():
        acc_ref[...] = jnp.zeros_like(acc_ref)

    acc_ref[...] += jnp.dot(x_ref[...], wt_ref[...],
                            preferred_element_type=jnp.float32)

    @pl.when(pl.program_id(2) == pl.num_programs(2) - 1)
    def _():
        o_ref[...] = (acc_ref[...] + b_ref[...]).astype(o_ref.dtype)


def linear_pallas(x2d, wt, b2, *, tm=256, tn=512, tk=512,
                  out_dtype=jnp.float32):
    """x2d: (M, K), wt: (K, N) pre-transposed weight, b2: (1, N) f32.
    bf16 inputs -> bf16 MXU with f32 accumulation; f32 inputs stay f32."""
    M, K = x2d.shape
    K2, N = wt.shape
    assert K == K2
    m_align = 16 if x2d.dtype == jnp.bfloat16 else 8   # bf16 sublane packing
    tm, Mp = _tile(M, tm, m_align)
    tk, Kp = _tile(K, tk, 128)
    tn, Np = _tile(N, tn, 128)
    if Mp != M or Kp != K:
        x2d = jnp.pad(x2d, ((0, Mp - M), (0, Kp - K)))
    if Kp != K or Np != N:
        wt = jnp.pad(wt, ((0, Kp - K), (0, Np - N)))
    if Np != N:
        b2 = jnp.pad(b2, ((0, 0), (0, Np - N)))

    grid = (Mp // tm, Np // tn, Kp // tk)
    out = pl.pallas_call(
        _linear_kernel,
        grid_spec=pltpu.PrefetchScalarGridSpec(
            num_scalar_prefetch=0,
            grid=grid,
            in_specs=[
                pl.BlockSpec((tm, tk), lambda i, j, k: (i, k)),
                pl.BlockSpec((tk, tn), lambda i, j, k: (k, j)),
                pl.BlockSpec((1, tn), lambda i, j, k: (0, j)),
            ],
            out_specs=pl.BlockSpec((tm, tn), lambda i, j, k: (i, j)),
            scratch_shapes=[pltpu.VMEM((tm, tn), jnp.float32)],
        ),
        out_shape=jax.ShapeDtypeStruct((Mp, Np), out_dtype),
        compiler_params=pltpu.CompilerParams(
            dimension_semantics=("parallel", "parallel", "arbitrary"),
            vmem_limit_bytes=_VMEM_LIMIT),
    )(x2d, wt, b2)
    if Mp != M or Np != N:
        out = out[:M, :N]
    return out


# ----------------------------------------------------------------------------
# Sparse gated flash attention.
#   grid = (B, n_active, q_tiles, kv_tiles); the active-head id (from SMEM
#   scalar prefetch) is used directly in the Q/K/V index_maps, so only the
#   selected heads are DMA'd.  Online softmax over kv tiles; routing gate is
#   folded into the final normalisation multiply.
# ----------------------------------------------------------------------------
def _sparse_flash_kernel(idx_ref, gate_ref, q_ref, k_ref, v_ref, o_ref,
                         m_sc, l_sc, acc_sc, *, scale):
    b = pl.program_id(0)
    a = pl.program_id(1)
    ki = pl.program_id(3)

    @pl.when(ki == 0)
    def _():
        m_sc[...] = jnp.full_like(m_sc, -jnp.inf)
        l_sc[...] = jnp.zeros_like(l_sc)
        acc_sc[...] = jnp.zeros_like(acc_sc)

    q = q_ref[...]                                   # (tq, Dh)  bf16/f32
    k = k_ref[...]                                   # (tk, Dh)
    s = jax.lax.dot_general(q, k, (((1,), (1,)), ((), ())),
                            preferred_element_type=jnp.float32) * scale

    m_prev = m_sc[...]
    m_new = jnp.maximum(m_prev, jnp.max(s, axis=-1, keepdims=True))
    alpha = jnp.exp(m_prev - m_new)
    p = jnp.exp(s - m_new)
    l_sc[...] = alpha * l_sc[...] + jnp.sum(p, axis=-1, keepdims=True)
    acc_sc[...] = alpha * acc_sc[...] + jnp.dot(
        p.astype(v_ref.dtype), v_ref[...], preferred_element_type=jnp.float32)
    m_sc[...] = m_new

    @pl.when(ki == pl.num_programs(3) - 1)
    def _():
        gate = gate_ref[b, a]                        # routing gate (SMEM scalar)
        norm = gate * pl.reciprocal(l_sc[...], approx=True)
        o_ref[...] = (acc_sc[...] * norm).astype(o_ref.dtype)


def sparse_flash_attention(idx, gate, qkv_hm, *, n_head, n_active, d_attn,
                           tq=256, tk=256):
    """idx/gate: (B, A) int32/f32 (sorted head ids, routing gates);
    qkv_hm: (B, 3*H, S, Dh) head-major packed [Q | K | V].
    Returns (B, A, S, Dh) f32 gated attention output."""
    B, threeH, S, Dh = qkv_hm.shape
    assert threeH == 3 * n_head and Dh == d_attn
    tq = _seq_tile(S, tq)
    tk = _seq_tile(S, tk)
    scale = 1.0 / (d_attn ** 0.5)
    grid = (B, n_active, S // tq, S // tk)
    kernel = functools.partial(_sparse_flash_kernel, scale=scale)

    def q_map(b, a, qi, ki, idx_ref, gate_ref):
        return (b, idx_ref[b, a], qi, 0)

    def k_map(b, a, qi, ki, idx_ref, gate_ref):
        return (b, n_head + idx_ref[b, a], ki, 0)

    def v_map(b, a, qi, ki, idx_ref, gate_ref):
        return (b, 2 * n_head + idx_ref[b, a], ki, 0)

    def o_map(b, a, qi, ki, idx_ref, gate_ref):
        return (b, a, qi, 0)

    return pl.pallas_call(
        kernel,
        grid_spec=pltpu.PrefetchScalarGridSpec(
            num_scalar_prefetch=2,                    # idx, gate -> SMEM
            grid=grid,
            in_specs=[
                pl.BlockSpec((None, None, tq, Dh), q_map),
                pl.BlockSpec((None, None, tk, Dh), k_map),
                pl.BlockSpec((None, None, tk, Dh), v_map),
            ],
            out_specs=pl.BlockSpec((None, None, tq, Dh), o_map),
            scratch_shapes=[
                pltpu.VMEM((tq, 1), jnp.float32),     # running max
                pltpu.VMEM((tq, 1), jnp.float32),     # running denom
                pltpu.VMEM((tq, Dh), jnp.float32),    # output accumulator
            ],
        ),
        out_shape=jax.ShapeDtypeStruct((B, n_active, S, Dh), jnp.float32),
        compiler_params=pltpu.CompilerParams(
            dimension_semantics=("parallel", "parallel", "parallel",
                                 "arbitrary"),
            vmem_limit_bytes=_VMEM_LIMIT),
    )(idx, gate, qkv_hm, qkv_hm, qkv_hm)


# ----------------------------------------------------------------------------
# One-time parameter preparation: fuse Q|K|V, pre-transpose, pre-cast.
# ----------------------------------------------------------------------------
def prepare_params(p, compute_dtype=jnp.bfloat16):
    qkv_w = jnp.concatenate([p["q_w"], p["k_w"], p["v_w"]], axis=0)  # (3HDh, D)
    qkv_b = jnp.concatenate([p["q_b"], p["k_b"], p["v_b"]], axis=0)
    return {
        # Big matmuls: bf16 MXU inputs (f32 accumulation inside the kernel).
        "qkv_wt": jnp.asarray(qkv_w, compute_dtype).T,               # (D, 3HDh)
        "qkv_b": jnp.asarray(qkv_b, jnp.float32).reshape(1, -1),
        "o_wt": jnp.asarray(p["o_w"], compute_dtype).T,              # (A*Dh, D)
        "o_b": jnp.asarray(p["o_b"], jnp.float32).reshape(1, -1),
        # Router stays f32 so the top-k head selection is untouched.
        "router_wt": jnp.asarray(p["router_w"], jnp.float32).T,      # (D, H)
        "router_b": jnp.asarray(p["router_b"], jnp.float32).reshape(1, -1),
        "ln_w": jnp.asarray(p["ln_w"], jnp.float32),
        "ln_b": jnp.asarray(p["ln_b"], jnp.float32),
    }


# ----------------------------------------------------------------------------
# Forward pass (Pallas matmuls + Pallas sparse flash attention + JAX routing glue)
# ----------------------------------------------------------------------------
def sparse_mha_forward(prep, x, n_head, n_active, d_attn):
    B, S, D = x.shape
    x2 = x.reshape(B * S, D)
    cdt = prep["qkv_wt"].dtype

    # ---- route() with route_type='mean' ----
    r = linear_pallas(x2, prep["router_wt"], prep["router_b"],
                      out_dtype=jnp.float32).reshape(B, S, n_head)
    pooled = jnp.mean(r, axis=1)                                # (B, n_head)
    mu = jnp.mean(pooled, axis=-1, keepdims=True)
    var = jnp.mean((pooled - mu) ** 2, axis=-1, keepdims=True)  # biased (LayerNorm)
    normed = (pooled - mu) / jnp.sqrt(var + 1e-5)
    normed = normed * prep["ln_w"] + prep["ln_b"]
    # noise == 0.0 -> create_noise contributes exactly zero (deterministic)
    dist = jax.nn.softmax(normed, axis=-1)                      # router_softmax(dim=1)

    # top-k heads; torch's boolean-mask gather yields ascending head-id order
    _, top_idx = jax.lax.top_k(dist, n_active)
    idx = jnp.sort(top_idx, axis=-1).astype(jnp.int32)          # (B, A)
    gate = jnp.take_along_axis(dist, idx, axis=-1).astype(jnp.float32)

    # ---- fused Q|K|V projection (bf16 MXU inputs, f32 accumulation) ----
    qkv = linear_pallas(x2.astype(cdt), prep["qkv_wt"], prep["qkv_b"],
                        out_dtype=cdt)                          # (B*S, 3*H*Dh)

    # Head-major layout pass (one XLA transpose) so the attention kernel can
    # DMA only the n_active selected heads via index_map gather.
    qkv_hm = qkv.reshape(B, S, 3 * n_head, d_attn).transpose(0, 2, 1, 3)

    # ---- sparse gated flash attention (Pallas) ----
    o = sparse_flash_attention(idx, gate, qkv_hm, n_head=n_head,
                               n_active=n_active, d_attn=d_attn)  # (B, A, S, Dh)

    # ---- output projection ----
    o_final = o.transpose(0, 2, 1, 3).reshape(B * S, n_active * d_attn)
    z = linear_pallas(o_final.astype(cdt), prep["o_wt"], prep["o_b"],
                      out_dtype=jnp.float32).reshape(B, S, D)
    return z, dist


# ----------------------------------------------------------------------------
# Pure-JAX f32 reference (mirrors the torch forward) for the correctness check
# ----------------------------------------------------------------------------
def reference_forward(params, x, n_head, n_active, d_attn):
    B, S, D = x.shape
    HI = jax.lax.Precision.HIGHEST
    lin = lambda a, w, b: jnp.dot(a, w.T, precision=HI) + b

    r = lin(x, params["router_w"], params["router_b"])
    pooled = jnp.mean(r, axis=1)
    mu = jnp.mean(pooled, -1, keepdims=True)
    var = jnp.mean((pooled - mu) ** 2, -1, keepdims=True)
    normed = (pooled - mu) / jnp.sqrt(var + 1e-5) * params["ln_w"] + params["ln_b"]
    dist = jax.nn.softmax(normed, -1)

    _, top_idx = jax.lax.top_k(dist, n_active)
    idx = jnp.sort(top_idx, -1)
    gate = jnp.take_along_axis(dist, idx, -1)

    def proj(wk, bk):
        return jnp.transpose(
            lin(x, params[wk], params[bk]).reshape(B, S, n_head, d_attn),
            (0, 2, 1, 3))

    q, k, v = proj("q_w", "q_b"), proj("k_w", "k_b"), proj("v_w", "v_b")
    barange = jnp.arange(B)[:, None]
    qs, ks, vs = q[barange, idx], k[barange, idx], v[barange, idx]  # (B,A,S,Dh)

    s = jnp.einsum("baqd,bakd->baqk", qs, ks, precision=HI) / (d_attn ** 0.5)
    p = jax.nn.softmax(s, -1)
    o = jnp.einsum("baqk,bakd->baqd", p, vs, precision=HI)
    og = gate[:, :, None, None] * o
    of = jnp.transpose(og, (0, 2, 1, 3)).reshape(B, S, n_active * d_attn)
    return lin(of, params["o_w"], params["o_b"])


# ----------------------------------------------------------------------------
# Deterministic parameter init (shapes from the module's __init__)
# ----------------------------------------------------------------------------
def init_params(key, n_head, n_active, d_model, d_attn):
    ks = jax.random.split(key, 10)

    def uni(k, shape, fan_in):
        bound = 1.0 / (fan_in ** 0.5)
        return jax.random.uniform(k, shape, jnp.float32, -bound, bound)

    p = {}
    xav = (2.0 / (n_head + d_model)) ** 0.5        # xavier_normal_ on router
    p["router_w"] = jax.random.normal(ks[0], (n_head, d_model), jnp.float32) * xav
    p["router_b"] = uni(ks[1], (n_head,), d_model)
    p["q_w"] = uni(ks[2], (d_attn * n_head, d_model), d_model)
    p["q_b"] = uni(ks[3], (d_attn * n_head,), d_model)
    p["k_w"] = uni(ks[4], (d_attn * n_head, d_model), d_model)
    p["k_b"] = uni(ks[5], (d_attn * n_head,), d_model)
    p["v_w"] = uni(ks[6], (d_attn * n_head, d_model), d_model)
    p["v_b"] = uni(ks[7], (d_attn * n_head,), d_model)
    p["o_w"] = uni(ks[8], (d_model, d_attn * n_active), d_attn * n_active)
    p["o_b"] = uni(ks[9], (d_model,), d_attn * n_active)
    p["ln_w"] = jnp.ones((n_head,), jnp.float32)   # nn.LayerNorm default init
    p["ln_b"] = jnp.zeros((n_head,), jnp.float32)
    return p


if __name__ == "__main__":
    B, S = 2, 8
    n_head, n_active, d_model, d_attn = 4, 2, 32, 16
    # route_type='mean', noise=0.0 (noise_step irrelevant at noise=0)
    # TODO(synk): torch.rand_like routing noise has no RNG-identical JAX
    #             equivalent; noise=0.0 makes its contribution exactly zero.
    # TODO(synk): route_type='sum' / 'att' branches are not implemented here.

    key = jax.random.PRNGKey(0)
    kx, kp = jax.random.split(key)
    x = jax.random.normal(kx, (B, S, d_model), jnp.float32)
    params = init_params(kp, n_head, n_active, d_model, d_attn)
    prep = prepare_params(params)   # fuse + transpose + cast weights ONCE

    fwd = jax.jit(functools.partial(sparse_mha_forward, n_head=n_head,
                                    n_active=n_active, d_attn=d_attn))
    z, dist = fwd(prep, x)
    z = jax.block_until_ready(z)

    z_ref = reference_forward(params, x, n_head, n_active, d_attn)
    assert z.shape == (B, S, d_model)
    # bf16 MXU inputs (with f32 accumulation) are an intentional precision
    # change recommended by the perf review; tolerance relaxed accordingly.
    assert jnp.allclose(z, z_ref, atol=5e-2, rtol=5e-2), "Pallas vs reference mismatch"

    print("KERNEL_OK")
</pallas_src>

<mosaic_0001>
module attributes {stable_mosaic.version = 11 : i64} {
  func.func @_linear_kernel(%arg0: i32, %arg1: i32, %arg2: i32, %arg3: memref<16x32xbf16, #tpu.memory_space<vmem>>, %arg4: memref<32x192xbf16, #tpu.memory_space<vmem>>, %arg5: memref<1x192xf32, #tpu.memory_space<vmem>>, %arg6: memref<16x192xbf16, #tpu.memory_space<vmem>>, %arg7: memref<16x192xf32, #tpu.memory_space<vmem>>) attributes {dimension_semantics = [#tpu.dimension_semantics<parallel>, #tpu.dimension_semantics<parallel>, #tpu.dimension_semantics<arbitrary>], iteration_bounds = array<i64: 1, 1, 1>, scalar_prefetch = 0 : i64, scratch_operands = 1 : i64, tpu.core_type = #tpu.core_type<tc>, window_params = [{transform_indices = @transform_0, window_bounds = array<i64: 16, 32>}, {transform_indices = @transform_1, window_bounds = array<i64: 32, 192>}, {transform_indices = @transform_2, window_bounds = array<i64: 1, 192>}, {transform_indices = @transform_3, window_bounds = array<i64: 16, 192>}]} {
    %c0_i32 = arith.constant 0 : i32
    %0 = arith.cmpi eq, %arg2, %c0_i32 : i32
    %1 = arith.extui %0 : i1 to i32
    %c0_i32_0 = arith.constant 0 : i32
    %2 = arith.cmpi ne, %1, %c0_i32_0 : i32
    scf.if %2 {
      %cst_10 = arith.constant 0.000000e+00 : f32
      %12 = vector.broadcast %cst_10 : f32 to vector<16x192xf32>
      %c0_11 = arith.constant 0 : index
      %c0_12 = arith.constant 0 : index
      %13 = vector.load %arg7[%c0_11, %c0_12] : memref<16x192xf32, #tpu.memory_space<vmem>>, vector<16x192xf32>
      tpu.vector_store %arg7[%c0_11, %c0_12], %12 {strides = array<i32>} : memref<16x192xf32, #tpu.memory_space<vmem>>, vector<16x192xf32>,
    } else {
    }
    %c0 = arith.constant 0 : index
    %c0_1 = arith.constant 0 : index
    %3 = vector.load %arg7[%c0, %c0_1] : memref<16x192xf32, #tpu.memory_space<vmem>>, vector<16x192xf32>
    %c0_2 = arith.constant 0 : index
    %c0_3 = arith.constant 0 : index
    %4 = vector.load %arg3[%c0_2, %c0_3] : memref<16x32xbf16, #tpu.memory_space<vmem>>, vector<16x32xbf16>
    %c0_4 = arith.constant 0 : index
    %c0_5 = arith.constant 0 : index
    %5 = vector.load %arg4[%c0_4, %c0_5] : memref<32x192xbf16, #tpu.memory_space<vmem>>, vector<32x192xbf16>
    %cst = arith.constant dense<0.000000e+00> : vector<16x192xf32>
    %6 = tpu.matmul %4, %5, %cst {dimension_numbers = #tpu.dot_dimension_numbers<[1], [0], [0], [1], [0, 0, 1, 1], [], []>} : vector<16x32xbf16>, vector<32x192xbf16>, vector<16x192xf32> -> vector<16x192xf32>
    %7 = arith.addf %3, %6 : vector<16x192xf32>
    %c0_6 = arith.constant 0 : index
    %c0_7 = arith.constant 0 : index
    %8 = vector.load %arg7[%c0_6, %c0_7] : memref<16x192xf32, #tpu.memory_space<vmem>>, vector<16x192xf32>
    tpu.vector_store %arg7[%c0_6, %c0_7], %7 {strides = array<i32>} : memref<16x192xf32, #tpu.memory_space<vmem>>, vector<16x192xf32>,
    %c0_i32_8 = arith.constant 0 : i32
    %9 = arith.cmpi eq, %arg2, %c0_i32_8 : i32
    %10 = arith.extui %9 : i1 to i32
    %c0_i32_9 = arith.constant 0 : i32
    %11 = arith.cmpi ne, %10, %c0_i32_9 : i32
    scf.if %11 {
      %c0_10 = arith.constant 0 : index
      %c0_11 = arith.constant 0 : index
      %12 = vector.load %arg7[%c0_10, %c0_11] : memref<16x192xf32, #tpu.memory_space<vmem>>, vector<16x192xf32>
      %c0_12 = arith.constant 0 : index
      %c0_13 = arith.constant 0 : index
      %13 = vector.load %arg5[%c0_12, %c0_13] : memref<1x192xf32, #tpu.memory_space<vmem>>, vector<1x192xf32>
      %14 = vector.broadcast %13 : vector<1x192xf32> to vector<16x192xf32>
      %15 = arith.addf %12, %14 : vector<16x192xf32>
      %16 = arith.truncf %15 : vector<16x192xf32> to vector<16x192xbf16>
      %c0_14 = arith.constant 0 : index
      %c0_15 = arith.constant 0 : index
      %17 = vector.load %arg6[%c0_14, %c0_15] : memref<16x192xbf16, #tpu.memory_space<vmem>>, vector<16x192xbf16>
      tpu.vector_store %arg6[%c0_14, %c0_15], %16 {strides = array<i32>} : memref<16x192xbf16, #tpu.memory_space<vmem>>, vector<16x192xbf16>,
    } else {
    }
    return
  }
  func.func @transform_0(%arg0: i32, %arg1: i32, %arg2: i32) -> (i32, i32) {
    %c0_i32 = arith.constant 0 : i32
    return %arg0, %arg2 : i32, i32
  }
  func.func @transform_1(%arg0: i32, %arg1: i32, %arg2: i32) -> (i32, i32) {
    %c0_i32 = arith.constant 0 : i32
    return %arg2, %arg1 : i32, i32
  }
  func.func @transform_2(%arg0: i32, %arg1: i32, %arg2: i32) -> (i32, i32) {
    %c0_i32 = arith.constant 0 : i32
    %c0_i32_0 = arith.constant 0 : i32
    return %c0_i32, %arg1 : i32, i32
  }
  func.func @transform_3(%arg0: i32, %arg1: i32, %arg2: i32) -> (i32, i32) {
    %c0_i32 = arith.constant 0 : i32
    return %arg0, %arg1 : i32, i32
  }
}

module attributes {stable_mosaic.version = 11 : i64} {
  func.func @_linear_kernel(%arg0: i32, %arg1: i32, %arg2: i32, %arg3: memref<16x32xf32, #tpu.memory_space<vmem>>, %arg4: memref<32x4xf32, #tpu.memory_space<vmem>>, %arg5: memref<1x4xf32, #tpu.memory_space<vmem>>, %arg6: memref<16x4xf32, #tpu.memory_space<vmem>>, %arg7: memref<16x4xf32, #tpu.memory_space<vmem>>) attributes {dimension_semantics = [#tpu.dimension_semantics<parallel>, #tpu.dimension_semantics<parallel>, #tpu.dimension_semantics<arbitrary>], iteration_bounds = array<i64: 1, 1, 1>, scalar_prefetch = 0 : i64, scratch_operands = 1 : i64, tpu.core_type = #tpu.core_type<tc>, window_params = [{transform_indices = @transform_0, window_bounds = array<i64: 16, 32>}, {transform_indices = @transform_1, window_bounds = array<i64: 32, 4>}, {transform_indices = @transform_2, window_bounds = array<i64: 1, 4>}, {transform_indices = @transform_3, window_bounds = array<i64: 16, 4>}]} {
    %c0_i32 = arith.constant 0 : i32
    %0 = arith.cmpi eq, %arg2, %c0_i32 : i32
    %1 = arith.extui %0 : i1 to i32
    %c0_i32_0 = arith.constant 0 : i32
    %2 = arith.cmpi ne, %1, %c0_i32_0 : i32
    scf.if %2 {
      %cst_10 = arith.constant 0.000000e+00 : f32
      %12 = vector.broadcast %cst_10 : f32 to vector<16x4xf32>
      %c0_11 = arith.constant 0 : index
      %c0_12 = arith.constant 0 : index
      %13 = vector.load %arg7[%c0_11, %c0_12] : memref<16x4xf32, #tpu.memory_space<vmem>>, vector<16x4xf32>
      tpu.vector_store %arg7[%c0_11, %c0_12], %12 {strides = array<i32>} : memref<16x4xf32, #tpu.memory_space<vmem>>, vector<16x4xf32>,
    } else {
    }
    %c0 = arith.constant 0 : index
    %c0_1 = arith.constant 0 : index
    %3 = vector.load %arg7[%c0, %c0_1] : memref<16x4xf32, #tpu.memory_space<vmem>>, vector<16x4xf32>
    %c0_2 = arith.constant 0 : index
    %c0_3 = arith.constant 0 : index
    %4 = vector.load %arg3[%c0_2, %c0_3] : memref<16x32xf32, #tpu.memory_space<vmem>>, vector<16x32xf32>
    %c0_4 = arith.constant 0 : index
    %c0_5 = arith.constant 0 : index
    %5 = vector.load %arg4[%c0_4, %c0_5] : memref<32x4xf32, #tpu.memory_space<vmem>>, vector<32x4xf32>
    %cst = arith.constant dense<0.000000e+00> : vector<16x4xf32>
    %6 = tpu.matmul %4, %5, %cst {dimension_numbers = #tpu.dot_dimension_numbers<[1], [0], [0], [1], [0, 0, 1, 1], [], []>} : vector<16x32xf32>, vector<32x4xf32>, vector<16x4xf32> -> vector<16x4xf32>
    %7 = arith.addf %3, %6 : vector<16x4xf32>
    %c0_6 = arith.constant 0 : index
    %c0_7 = arith.constant 0 : index
    %8 = vector.load %arg7[%c0_6, %c0_7] : memref<16x4xf32, #tpu.memory_space<vmem>>, vector<16x4xf32>
    tpu.vector_store %arg7[%c0_6, %c0_7], %7 {strides = array<i32>} : memref<16x4xf32, #tpu.memory_space<vmem>>, vector<16x4xf32>,
    %c0_i32_8 = arith.constant 0 : i32
    %9 = arith.cmpi eq, %arg2, %c0_i32_8 : i32
    %10 = arith.extui %9 : i1 to i32
    %c0_i32_9 = arith.constant 0 : i32
    %11 = arith.cmpi ne, %10, %c0_i32_9 : i32
    scf.if %11 {
      %c0_10 = arith.constant 0 : index
      %c0_11 = arith.constant 0 : index
      %12 = vector.load %arg7[%c0_10, %c0_11] : memref<16x4xf32, #tpu.memory_space<vmem>>, vector<16x4xf32>
      %c0_12 = arith.constant 0 : index
      %c0_13 = arith.constant 0 : index
      %13 = vector.load %arg5[%c0_12, %c0_13] : memref<1x4xf32, #tpu.memory_space<vmem>>, vector<1x4xf32>
      %14 = vector.broadcast %13 : vector<1x4xf32> to vector<16x4xf32>
      %15 = arith.addf %12, %14 : vector<16x4xf32>
      %c0_14 = arith.constant 0 : index
      %c0_15 = arith.constant 0 : index
      %16 = vector.load %arg6[%c0_14, %c0_15] : memref<16x4xf32, #tpu.memory_space<vmem>>, vector<16x4xf32>
      tpu.vector_store %arg6[%c0_14, %c0_15], %15 {strides = array<i32>} : memref<16x4xf32, #tpu.memory_space<vmem>>, vector<16x4xf32>,
    } else {
    }
    return
  }
  func.func @transform_0(%arg0: i32, %arg1: i32, %arg2: i32) -> (i32, i32) {
    %c0_i32 = arith.constant 0 : i32
    return %arg0, %arg2 : i32, i32
  }
  func.func @transform_1(%arg0: i32, %arg1: i32, %arg2: i32) -> (i32, i32) {
    %c0_i32 = arith.constant 0 : i32
    return %arg2, %arg1 : i32, i32
  }
  func.func @transform_2(%arg0: i32, %arg1: i32, %arg2: i32) -> (i32, i32) {
    %c0_i32 = arith.constant 0 : i32
    %c0_i32_0 = arith.constant 0 : i32
    return %c0_i32, %arg1 : i32, i32
  }
  func.func @transform_3(%arg0: i32, %arg1: i32, %arg2: i32) -> (i32, i32) {
    %c0_i32 = arith.constant 0 : i32
    return %arg0, %arg1 : i32, i32
  }
}

module attributes {stable_mosaic.version = 11 : i64} {
  func.func @_sparse_flash_kernel(%arg0: i32, %arg1: i32, %arg2: i32, %arg3: i32, %arg4: memref<2x2xi32, #tpu.memory_space<smem>>, %arg5: memref<2x2xf32, #tpu.memory_space<smem>>, %arg6: memref<1x1x8x16xbf16, #tpu.memory_space<vmem>>, %arg7: memref<1x1x8x16xbf16, #tpu.memory_space<vmem>>, %arg8: memref<1x1x8x16xbf16, #tpu.memory_space<vmem>>, %arg9: memref<1x1x8x16xf32, #tpu.memory_space<vmem>>, %arg10: memref<8x1xf32, #tpu.memory_space<vmem>>, %arg11: memref<8x1xf32, #tpu.memory_space<vmem>>, %arg12: memref<8x16xf32, #tpu.memory_space<vmem>>) attributes {dimension_semantics = [#tpu.dimension_semantics<parallel>, #tpu.dimension_semantics<parallel>, #tpu.dimension_semantics<parallel>, #tpu.dimension_semantics<arbitrary>], iteration_bounds = array<i64: 2, 2, 1, 1>, scalar_prefetch = 2 : i64, scratch_operands = 3 : i64, tpu.core_type = #tpu.core_type<tc>, window_params = [{transform_indices = @transform_0, window_bounds = array<i64: 1, 1, 8, 16>}, {transform_indices = @transform_1, window_bounds = array<i64: 1, 1, 8, 16>}, {transform_indices = @transform_2, window_bounds = array<i64: 1, 1, 8, 16>}, {transform_indices = @transform_3, window_bounds = array<i64: 1, 1, 8, 16>}]} {
    %c0_i32 = arith.constant 0 : i32
    %0 = arith.cmpi eq, %arg3, %c0_i32 : i32
    %1 = arith.extui %0 : i1 to i32
    %c0_i32_0 = arith.constant 0 : i32
    %2 = arith.cmpi ne, %1, %c0_i32_0 : i32
    scf.if %2 {
      %cst_30 = arith.constant 0xFF800000 : f32
      %38 = vector.broadcast %cst_30 : f32 to vector<8x1xf32>
      %c0_31 = arith.constant 0 : index
      %c0_32 = arith.constant 0 : index
      %39 = vector.load %arg10[%c0_31, %c0_32] : memref<8x1xf32, #tpu.memory_space<vmem>>, vector<8x1xf32>
      tpu.vector_store %arg10[%c0_31, %c0_32], %38 {strides = array<i32>} : memref<8x1xf32, #tpu.memory_space<vmem>>, vector<8x1xf32>,
      %cst_33 = arith.constant 0.000000e+00 : f32
      %40 = vector.broadcast %cst_33 : f32 to vector<8x1xf32>
      %c0_34 = arith.constant 0 : index
      %c0_35 = arith.constant 0 : index
      %41 = vector.load %arg11[%c0_34, %c0_35] : memref<8x1xf32, #tpu.memory_space<vmem>>, vector<8x1xf32>
      tpu.vector_store %arg11[%c0_34, %c0_35], %40 {strides = array<i32>} : memref<8x1xf32, #tpu.memory_space<vmem>>, vector<8x1xf32>,
      %cst_36 = arith.constant 0.000000e+00 : f32
      %42 = vector.broadcast %cst_36 : f32 to vector<8x16xf32>
      %c0_37 = arith.constant 0 : index
      %c0_38 = arith.constant 0 : index
      %43 = vector.load %arg12[%c0_37, %c0_38] : memref<8x16xf32, #tpu.memory_space<vmem>>, vector<8x16xf32>
      tpu.vector_store %arg12[%c0_37, %c0_38], %42 {strides = array<i32>} : memref<8x16xf32, #tpu.memory_space<vmem>>, vector<8x16xf32>,
    } else {
    }
    %c0 = arith.constant 0 : index
    %c0_1 = arith.constant 0 : index
    %c0_2 = arith.constant 0 : index
    %c0_3 = arith.constant 0 : index
    %3 = vector.load %arg6[%c0, %c0_1, %c0_2, %c0_3] : memref<1x1x8x16xbf16, #tpu.memory_space<vmem>>, vector<1x1x8x16xbf16>
    %4 = vector.shape_cast %3 : vector<1x1x8x16xbf16> to vector<8x16xbf16>
    %c0_4 = arith.constant 0 : index
    %c0_5 = arith.constant 0 : index
    %c0_6 = arith.constant 0 : index
    %c0_7 = arith.constant 0 : index
    %5 = vector.load %arg7[%c0_4, %c0_5, %c0_6, %c0_7] : memref<1x1x8x16xbf16, #tpu.memory_space<vmem>>, vector<1x1x8x16xbf16>
    %6 = vector.shape_cast %5 : vector<1x1x8x16xbf16> to vector<8x16xbf16>
    %cst = arith.constant dense<0.000000e+00> : vector<8x8xf32>
    %7 = tpu.matmul %4, %6, %cst {dimension_numbers = #tpu.dot_dimension_numbers<[1], [1], [0], [0], [0, 0, 1, 0], [], []>} : vector<8x16xbf16>, vector<8x16xbf16>, vector<8x8xf32> -> vector<8x8xf32>
    %cst_8 = arith.constant 2.500000e-01 : f32
    %8 = vector.broadcast %cst_8 : f32 to vector<8x8xf32>
    %9 = arith.mulf %7, %8 : vector<8x8xf32>
    %c0_9 = arith.constant 0 : index
    %c0_10 = arith.constant 0 : index
    %10 = vector.load %arg10[%c0_9, %c0_10] : memref<8x1xf32, #tpu.memory_space<vmem>>, vector<8x1xf32>
    %cst_11 = arith.constant dense<0xFF800000> : vector<8xf32>
    %11 = vector.multi_reduction <maximumf>, %9, %cst_11 [1] : vector<8x8xf32> to vector<8xf32>
    %12 = vector.shape_cast %11 : vector<8xf32> to vector<8x1xf32>
    %13 = arith.maximumf %10, %12 : vector<8x1xf32>
    %14 = arith.subf %10, %13 : vector<8x1xf32>
    %15 = math.exp %14 : vector<8x1xf32>
    %16 = vector.broadcast %13 : vector<8x1xf32> to vector<8x8xf32>
    %17 = arith.subf %9, %16 : vector<8x8xf32>
    %18 = math.exp %17 : vector<8x8xf32>
    %c0_12 = arith.constant 0 : index
    %c0_13 = arith.constant 0 : index
    %19 = vector.load %arg11[%c0_12, %c0_13] : memref<8x1xf32, #tpu.memory_space<vmem>>, vector<8x1xf32>
    %20 = arith.mulf %15, %19 : vector<8x1xf32>
    %cst_14 = arith.constant dense<0.000000e+00> : vector<8xf32>
    %21 = vector.multi_reduction <add>, %18, %cst_14 [1] : vector<8x8xf32> to vector<8xf32>
    %22 = vector.shape_cast %21 : vector<8xf32> to vector<8x1xf32>
    %23 = arith.addf %20, %22 : vector<8x1xf32>
    %c0_15 = arith.constant 0 : index
    %c0_16 = arith.constant 0 : index
    %24 = vector.load %arg11[%c0_15, %c0_16] : memref<8x1xf32, #tpu.memory_space<vmem>>, vector<8x1xf32>
    tpu.vector_store %arg11[%c0_15, %c0_16], %23 {strides = array<i32>} : memref<8x1xf32, #tpu.memory_space<vmem>>, vector<8x1xf32>,
    %c0_17 = arith.constant 0 : index
    %c0_18 = arith.constant 0 : index
    %25 = vector.load %arg12[%c0_17, %c0_18] : memref<8x16xf32, #tpu.memory_space<vmem>>, vector<8x16xf32>
    %26 = vector.broadcast %15 : vector<8x1xf32> to vector<8x16xf32>
    %27 = arith.mulf %26, %25 : vector<8x16xf32>
    %28 = arith.truncf %18 : vector<8x8xf32> to vector<8x8xbf16>
    %c0_19 = arith.constant 0 : index
    %c0_20 = arith.constant 0 : index
    %c0_21 = arith.constant 0 : index
    %c0_22 = arith.constant 0 : index
    %29 = vector.load %arg8[%c0_19, %c0_20, %c0_21, %c0_22] : memref<1x1x8x16xbf16, #tpu.memory_space<vmem>>, vector<1x1x8x16xbf16>
    %30 = vector.shape_cast %29 : vector<1x1x8x16xbf16> to vector<8x16xbf16>
    %cst_23 = arith.constant dense<0.000000e+00> : vector<8x16xf32>
    %31 = tpu.matmul %28, %30, %cst_23 {dimension_numbers = #tpu.dot_dimension_numbers<[1], [0], [0], [1], [0, 0, 1, 1], [], []>} : vector<8x8xbf16>, vector<8x16xbf16>, vector<8x16xf32> -> vector<8x16xf32>
    %32 = arith.addf %27, %31 : vector<8x16xf32>
    %c0_24 = arith.constant 0 : index
    %c0_25 = arith.constant 0 : index
    %33 = vector.load %arg12[%c0_24, %c0_25] : memref<8x16xf32, #tpu.memory_space<vmem>>, vector<8x16xf32>
    tpu.vector_store %arg12[%c0_24, %c0_25], %32 {strides = array<i32>} : memref<8x16xf32, #tpu.memory_space<vmem>>, vector<8x16xf32>,
    %c0_26 = arith.constant 0 : index
    %c0_27 = arith.constant 0 : index
    %34 = vector.load %arg10[%c0_26, %c0_27] : memref<8x1xf32, #tpu.memory_space<vmem>>, vector<8x1xf32>
    tpu.vector_store %arg10[%c0_26, %c0_27], %13 {strides = array<i32>} : memref<8x1xf32, #tpu.memory_space<vmem>>, vector<8x1xf32>,
    %c0_i32_28 = arith.constant 0 : i32
    %35 = arith.cmpi eq, %arg3, %c0_i32_28 : i32
    %36 = arith.extui %35 : i1 to i32
    %c0_i32_29 = arith.constant 0 : i32
    %37 = arith.cmpi ne, %36, %c0_i32_29 : i32
    scf.if %37 {
      %38 = arith.index_cast %arg0 : i32 to index
      %39 = arith.index_cast %arg1 : i32 to index
      %40 = memref.load %arg5[%38, %39] : memref<2x2xf32, #tpu.memory_space<smem>>
      %c0_30 = arith.constant 0 : index
      %c0_31 = arith.constant 0 : index
      %41 = vector.load %arg11[%c0_30, %c0_31] : memref<8x1xf32, #tpu.memory_space<vmem>>, vector<8x1xf32>
      %42 = tpu.reciprocal %41 {approx = true} : vector<8x1xf32> -> vector<8x1xf32>
      %43 = vector.broadcast %40 : f32 to vector<8x1xf32>
      %44 = arith.mulf %43, %42 : vector<8x1xf32>
      %c0_32 = arith.constant 0 : index
      %c0_33 = arith.constant 0 : index
      %45 = vector.load %arg12[%c0_32, %c0_33] : memref<8x16xf32, #tpu.memory_space<vmem>>, vector<8x16xf32>
      %46 = vector.broadcast %44 : vector<8x1xf32> to vector<8x16xf32>
      %47 = arith.mulf %45, %46 : vector<8x16xf32>
      %c0_34 = arith.constant 0 : index
      %c0_35 = arith.constant 0 : index
      %c0_36 = arith.constant 0 : index
      %c0_37 = arith.constant 0 : index
      %48 = vector.load %arg9[%c0_34, %c0_35, %c0_36, %c0_37] : memref<1x1x8x16xf32, #tpu.memory_space<vmem>>, vector<1x1x8x16xf32>
      %49 = vector.shape_cast %48 : vector<1x1x8x16xf32> to vector<8x16xf32>
      %50 = vector.shape_cast %47 : vector<8x16xf32> to vector<1x1x8x16xf32>
      tpu.vector_store %arg9[%c0_34, %c0_35, %c0_36, %c0_37], %50 {strides = array<i32>} : memref<1x1x8x16xf32, #tpu.memory_space<vmem>>, vector<1x1x8x16xf32>,
    } else {
    }
    return
  }
  func.func @transform_0(%arg0: i32, %arg1: i32, %arg2: i32, %arg3: i32, %arg4: memref<2x2xi32, #tpu.memory_space<smem>>, %arg5: memref<2x2xf32, #tpu.memory_space<smem>>) -> (i32, i32, i32, i32) {
    %0 = arith.index_cast %arg0 : i32 to index
    %1 = arith.index_cast %arg1 : i32 to index
    %2 = memref.load %arg4[%0, %1] : memref<2x2xi32, #tpu.memory_space<smem>>
    %c0_i32 = arith.constant 0 : i32
    %c0_i32_0 = arith.constant 0 : i32
    return %arg0, %2, %arg2, %c0_i32 : i32, i32, i32, i32
  }
  func.func @transform_1(%arg0: i32, %arg1: i32, %arg2: i32, %arg3: i32, %arg4: memref<2x2xi32, #tpu.memory_space<smem>>, %arg5: memref<2x2xf32, #tpu.memory_space<smem>>) -> (i32, i32, i32, i32) {
    %0 = arith.index_cast %arg0 : i32 to index
    %1 = arith.index_cast %arg1 : i32 to index
    %2 = memref.load %arg4[%0, %1] : memref<2x2xi32, #tpu.memory_space<smem>>
    %c4_i32 = arith.constant 4 : i32
    %3 = arith.addi %c4_i32, %2 : i32
    %c0_i32 = arith.constant 0 : i32
    %c0_i32_0 = arith.constant 0 : i32
    return %arg0, %3, %arg3, %c0_i32 : i32, i32, i32, i32
  }
  func.func @transform_2(%arg0: i32, %arg1: i32, %arg2: i32, %arg3: i32, %arg4: memref<2x2xi32, #tpu.memory_space<smem>>, %arg5: memref<2x2xf32, #tpu.memory_space<smem>>) -> (i32, i32, i32, i32) {
    %0 = arith.index_cast %arg0 : i32 to index
    %1 = arith.index_cast %arg1 : i32 to index
    %2 = memref.load %arg4[%0, %1] : memref<2x2xi32, #tpu.memory_space<smem>>
    %c8_i32 = arith.constant 8 : i32
    %3 = arith.addi %c8_i32, %2 : i32
    %c0_i32 = arith.constant 0 : i32
    %c0_i32_0 = arith.constant 0 : i32
    return %arg0, %3, %arg3, %c0_i32 : i32, i32, i32, i32
  }
  func.func @transform_3(%arg0: i32, %arg1: i32, %arg2: i32, %arg3: i32, %arg4: memref<2x2xi32, #tpu.memory_space<smem>>, %arg5: memref<2x2xf32, #tpu.memory_space<smem>>) -> (i32, i32, i32, i32) {
    %c0_i32 = arith.constant 0 : i32
    %c0_i32_0 = arith.constant 0 : i32
    return %arg0, %arg1, %arg2, %c0_i32 : i32, i32, i32, i32
  }
}

module attributes {stable_mosaic.version = 11 : i64} {
  func.func @_linear_kernel(%arg0: i32, %arg1: i32, %arg2: i32, %arg3: memref<16x32xbf16, #tpu.memory_space<vmem>>, %arg4: memref<32x32xbf16, #tpu.memory_space<vmem>>, %arg5: memref<1x32xf32, #tpu.memory_space<vmem>>, %arg6: memref<16x32xf32, #tpu.memory_space<vmem>>, %arg7: memref<16x32xf32, #tpu.memory_space<vmem>>) attributes {dimension_semantics = [#tpu.dimension_semantics<parallel>, #tpu.dimension_semantics<parallel>, #tpu.dimension_semantics<arbitrary>], iteration_bounds = array<i64: 1, 1, 1>, scalar_prefetch = 0 : i64, scratch_operands = 1 : i64, tpu.core_type = #tpu.core_type<tc>, window_params = [{transform_indices = @transform_0, window_bounds = array<i64: 16, 32>}, {transform_indices = @transform_1, window_bounds = array<i64: 32, 32>}, {transform_indices = @transform_2, window_bounds = array<i64: 1, 32>}, {transform_indices = @transform_3, window_bounds = array<i64: 16, 32>}]} {
    %c0_i32 = arith.constant 0 : i32
    %0 = arith.cmpi eq, %arg2, %c0_i32 : i32
    %1 = arith.extui %0 : i1 to i32
    %c0_i32_0 = arith.constant 0 : i32
    %2 = arith.cmpi ne, %1, %c0_i32_0 : i32
    scf.if %2 {
      %cst_10 = arith.constant 0.000000e+00 : f32
      %12 = vector.broadcast %cst_10 : f32 to vector<16x32xf32>
      %c0_11 = arith.constant 0 : index
      %c0_12 = arith.constant 0 : index
      %13 = vector.load %arg7[%c0_11, %c0_12] : memref<16x32xf32, #tpu.memory_space<vmem>>, vector<16x32xf32>
      tpu.vector_store %arg7[%c0_11, %c0_12], %12 {strides = array<i32>} : memref<16x32xf32, #tpu.memory_space<vmem>>, vector<16x32xf32>,
    } else {
    }
    %c0 = arith.constant 0 : index
    %c0_1 = arith.constant 0 : index
    %3 = vector.load %arg7[%c0, %c0_1] : memref<16x32xf32, #tpu.memory_space<vmem>>, vector<16x32xf32>
    %c0_2 = arith.constant 0 : index
    %c0_3 = arith.constant 0 : index
    %4 = vector.load %arg3[%c0_2, %c0_3] : memref<16x32xbf16, #tpu.memory_space<vmem>>, vector<16x32xbf16>
    %c0_4 = arith.constant 0 : index
    %c0_5 = arith.constant 0 : index
    %5 = vector.load %arg4[%c0_4, %c0_5] : memref<32x32xbf16, #tpu.memory_space<vmem>>, vector<32x32xbf16>
    %cst = arith.constant dense<0.000000e+00> : vector<16x32xf32>
    %6 = tpu.matmul %4, %5, %cst {dimension_numbers = #tpu.dot_dimension_numbers<[1], [0], [0], [1], [0, 0, 1, 1], [], []>} : vector<16x32xbf16>, vector<32x32xbf16>, vector<16x32xf32> -> vector<16x32xf32>
    %7 = arith.addf %3, %6 : vector<16x32xf32>
    %c0_6 = arith.constant 0 : index
    %c0_7 = arith.constant 0 : index
    %8 = vector.load %arg7[%c0_6, %c0_7] : memref<16x32xf32, #tpu.memory_space<vmem>>, vector<16x32xf32>
    tpu.vector_store %arg7[%c0_6, %c0_7], %7 {strides = array<i32>} : memref<16x32xf32, #tpu.memory_space<vmem>>, vector<16x32xf32>,
    %c0_i32_8 = arith.constant 0 : i32
    %9 = arith.cmpi eq, %arg2, %c0_i32_8 : i32
    %10 = arith.extui %9 : i1 to i32
    %c0_i32_9 = arith.constant 0 : i32
    %11 = arith.cmpi ne, %10, %c0_i32_9 : i32
    scf.if %11 {
      %c0_10 = arith.constant 0 : index
      %c0_11 = arith.constant 0 : index
      %12 = vector.load %arg7[%c0_10, %c0_11] : memref<16x32xf32, #tpu.memory_space<vmem>>, vector<16x32xf32>
      %c0_12 = arith.constant 0 : index
      %c0_13 = arith.constant 0 : index
      %13 = vector.load %arg5[%c0_12, %c0_13] : memref<1x32xf32, #tpu.memory_space<vmem>>, vector<1x32xf32>
      %14 = vector.broadcast %13 : vector<1x32xf32> to vector<16x32xf32>
      %15 = arith.addf %12, %14 : vector<16x32xf32>
      %c0_14 = arith.constant 0 : index
      %c0_15 = arith.constant 0 : index
      %16 = vector.load %arg6[%c0_14, %c0_15] : memref<16x32xf32, #tpu.memory_space<vmem>>, vector<16x32xf32>
      tpu.vector_store %arg6[%c0_14, %c0_15], %15 {strides = array<i32>} : memref<16x32xf32, #tpu.memory_space<vmem>>, vector<16x32xf32>,
    } else {
    }
    return
  }
  func.func @transform_0(%arg0: i32, %arg1: i32, %arg2: i32) -> (i32, i32) {
    %c0_i32 = arith.constant 0 : i32
    return %arg0, %arg2 : i32, i32
  }
  func.func @transform_1(%arg0: i32, %arg1: i32, %arg2: i32) -> (i32, i32) {
    %c0_i32 = arith.constant 0 : i32
    return %arg2, %arg1 : i32, i32
  }
  func.func @transform_2(%arg0: i32, %arg1: i32, %arg2: i32) -> (i32, i32) {
    %c0_i32 = arith.constant 0 : i32
    %c0_i32_0 = arith.constant 0 : i32
    return %c0_i32, %arg1 : i32, i32
  }
  func.func @transform_3(%arg0: i32, %arg1: i32, %arg2: i32) -> (i32, i32) {
    %c0_i32 = arith.constant 0 : i32
    return %arg0, %arg1 : i32, i32
  }
}

</mosaic_0001>

<bundles_post_ra>
// kernel: sparse_mha_forward.5
= control target key start
LH: loop header
LB: loop body
LE: loop exit
PB: predicated region body
PF: predicated region fallthrough
CT: control target
= control target key end

     0   :  { %8 = vsyncpa [#allocation4], 0  ;;  %s218_s12 = smov [#allocation3]   ;;  %s262_s0 = inlined_call_operand.vmem [shape: bf16[16,32], index: 0, kind: input, shape index: {}]   ;;  %s263_s1 = inlined_call_operand.hbm [shape: bf16[32,192], index: 1, kind: input, shape index: {}]   ;;  %s264_s2 = inlined_call_operand.vmem [shape: f32[1,192], index: 2, kind: input, shape index: {}]   ;;  %s265_s3 = inlined_call_operand.vmem [shape: bf16[16,192], index: 3, kind: output, shape index: {}]  }
   0x1   :  { %s16_s13 = sshll.u32 %s218_s12, 4  ;;  %s17_s13 = int_to_ptr.vmem [resolvable:$true] %s16_s13 }
   0x2   :  { %s204_s14 = scalar_lea.vmem %s17_s13, 512  ;;  %p209_p1 = scmp.lt.s32.totalorder %s17_s13, %s17_s13 }
   0x3   :  { %p205_p0 = scmp.ne.s32.totalorder %s17_s13, %s204_s14  ;;  %p210_p2 = scmp.lt.s32.totalorder %s204_s14, %s204_s14 }
   0x5   :  { %p211_p3 = por %p210_p2, %p209_p1 }
   0x7   :  { %p212_p4 = pnand %p211_p3, %p205_p0 }
   0x9   :  { %215 = shalt.err (!%p212_p4)
}
   0xa   :  { %s219_s15 = smov 128   ;;  %s220_s16 = smov 8  }
   0xb   :  { %22 = dma.hbm_to_vmem [thread:$0]  %s263_s1, 512, %s17_s13, [#allocation4], %s219_s15, %s219_s15, %s220_s16  }
   0xc   :  { %216 = dma.done.wait [#allocation4], 512  }
   0xd   :  { %217 = vsyncadd [#allocation4], 4294966784  ;;  %v221_v0 = vmov 0   ;;  %v189_v1 = vld [vmem:[#allocation3 + $0x14] ss:$8 sps:$4 sm:$0xff]   ;;  %v195_v5 = vld [vmem:[%s262_s0] sm:$0xff]   ;;  %v138_v7 = vlaneseq }
   0xe   :  { %109 = vmatprep.mubr.bf16.mxu0 %v221_v0  ;;  %v191_v2 = vld [vmem:[#allocation3 + $0x10] ss:$8 sps:$4 sm:$0xff]   ;;  %89 = vmatprep.subr.bf16.mxu0 %v189_v1  ;;  %v192_v3 = vld [vmem:[#allocation3 + $0x4] ss:$8 sps:$4 sm:$0xff]   ;;  %v194_v4 = vld [vmem:[#allocation3] ss:$8 sps:$4 sm:$0xff]  }
   0xf   :  { %90 = vmatpush1.bf16.msra.mxu0 %v191_v2  ;;  %vm73_vm0 = vcmask 261120   ;;  %vm34_vm1 = vcmask 523264   ;;  %v222_v6 = vmov 0.0   ;;  %v139_v10 = vshrl.u32 %v138_v7, 7  ;;  %v136_v17 = vld [vmem:[%s264_s2] sm:$0x3] }
  0x10   :  { %91 = vmatprep.subr.bf16.mxu0 %v192_v3  ;;  %35 = vst.msk [vmem:[#allocation2 + $0x8] sm:$0xff] %vm34_vm1, %v222_v6  ;;  %37 = vst.msk [vmem:[#allocation2 + $0x18] sm:$0xff] %vm34_vm1, %v222_v6  ;;  %vm164_vm2 = vcmask 1043456   ;;  %vm165_vm3 = vcmask 523268  }
  0x11   :  { %v140_v15 = vsub.s32 0, %v139_v10  ;;  %v144_v16 = vsub.s32 1, %v139_v10  ;;  %vm166_vm4 = vmor %vm165_vm3, %vm164_vm2 }
  0x13   :  { %92 = vmatpush1.bf16.msra.mxu0 %v194_v4  ;;  %v141_v20 = vrot.slane %v136_v17, %v140_v15  ;;  %v145_v21 = vrot.slane %v136_v17, %v144_v16 }
  0x16   :  { %179 = vmatmul.mubr.msk.bf16.vlgmr.msra.gmra.mxu0 %vm73_vm0, %v195_v5 }
  0x17   :  { %v39_v9 = vld [vmem:[#allocation2 + $0x8] sm:$0xff]  ;;  %v41_v14 = vld [vmem:[#allocation2 + $0x18] sm:$0xff] }
  0xd6   :  { %v111_v8 = vpop.f32.mrf.mxu0 }
  0xd7   :  { %v148_v23 = vadd.f32 %v141_v20, %v111_v8 }
  0xd8   :  { %v113_v11 = vpop.f32.mrf.mxu0 }
  0xd9   :  { %v121_v12 = vadd.f32 %v113_v11, %v39_v9 }
  0xda   :  { %v115_v13 = vpop.f32.mrf.mxu0 }
  0xdb   :  { %126 = vst.msk [vmem:[#allocation2 + $0x8] sm:$0xff] %vm34_vm1, %v121_v12  ;;  %v150_v27 = vadd.f32 %v141_v20, %v115_v13 }
  0xdc   :  { %v117_v18 = vpop.f32.mrf.mxu0 }
  0xdd   :  { %v123_v19 = vadd.f32 %v117_v18, %v41_v14 }
  0xdf   :  { %128 = vst.msk [vmem:[#allocation2 + $0x18] sm:$0xff] %vm34_vm1, %v123_v19 }
  0xe2   :  { %v133_v22 = vld [vmem:[#allocation2 + $0x8] sm:$0xff] }
  0xe3   :  { %v149_v24 = vadd.f32 %v145_v21, %v133_v22 }
  0xe5   :  { %v182_v25 = vpack.c.bf16 %v149_v24, %v148_v23 }
  0xe6   :  { %v135_v26 = vld [vmem:[#allocation2 + $0x18] sm:$0xff] }
  0xe7   :  { %167 = vst.msk [vmem:[%s265_s3] sm:$0xff] %vm166_vm4, %v182_v25  ;;  %v151_v28 = vadd.f32 %v145_v21, %v135_v26 }
  0xe9   :  { %v183_v29 = vpack.c.bf16 %v151_v28, %v150_v27 }
  0xeb   :  { %168 = vst.msk [vmem:[%s265_s3 + $0x8] sm:$0xff] %vm166_vm4, %v183_v29 }
  0xec   :  { %173 = vsyncpa [#allocation4], 1 }

// kernel: sparse_mha_forward.4
= control target key start
LH: loop header
LB: loop body
LE: loop exit
PB: predicated region body
PF: predicated region fallthrough
CT: control target
= control target key end

     0   :  { %vm29_vm0 = vcmask 261120   ;;  %vm18_vm1 = vcmask 31744   ;;  %v157_v2 = vmov 0.0   ;;  %s213_s1 = inlined_call_operand.vmem [shape: f32[32,4], index: 1, kind: input, shape index: {}]   ;;  %s214_s0 = inlined_call_operand.vmem [shape: f32[16,32], index: 0, kind: input, shape index: {}]   ;;  %s215_s2 = inlined_call_operand.vmem [shape: f32[1,4], index: 2, kind: input, shape index: {}]   ;;  %s216_s3 = inlined_call_operand.vmem [shape: f32[16,4], index: 3, kind: output, shape index: {}]  }
   0x1   :  { %v28_v0 = vld [vmem:[%s213_s1 + $0x18] sm:$0xff]  ;;  %v27_v1 = vld [vmem:[%s213_s1 + $0x10] sm:$0xff]  ;;  %20 = vst.msk [vmem:[#allocation2 + $0x8] sm:$0xff] %vm18_vm1, %v157_v2  ;;  %19 = vst.msk [vmem:[#allocation2] sm:$0xff] %vm18_vm1, %v157_v2 }
   0x2   :  { %145 = vmatprep.subr.mxu0 %v28_v0  ;;  %v23_v3 = vld [vmem:[%s214_s0] sm:$0xff]  ;;  %v26_v4 = vld [vmem:[%s213_s1 + $0x8] sm:$0xff] }
   0x3   :  { %146 = vmatpush3.msra.mxu0 %v28_v0  ;;  %153 = vmatprep.mubr.msk.f32.mxu0 %vm29_vm0, %v23_v3  ;;  %v25_v5 = vld [vmem:[%s213_s1] sm:$0xff]  ;;  %v24_v6 = vld [vmem:[%s214_s0 + $0x8] sm:$0xff] }
   0x4   :  { %147 = vmatprep.subr.mxu0 %v27_v1  ;;  %v138_v13 = vld [vmem:[%s215_s2] ss:$0 sm:$0xff] }
   0x5   :  { %148 = vmatpush3.msra.mxu0 %v27_v1 }
   0x6   :  { %149 = vmatprep.subr.mxu0 %v26_v4 }
   0x7   :  { %150 = vmatpush3.msra.mxu0 %v26_v4 }
   0x8   :  { %151 = vmatprep.subr.mxu0 %v25_v5  ;;  %v22_v7 = vld [vmem:[#allocation2 + $0x8] sm:$0xff]  ;;  %v21_v9 = vld [vmem:[#allocation2] sm:$0xff] }
   0x9   :  { %152 = vmatpush3.msra.mxu0 %v25_v5 }
   0xa   :  { %154 = vmatmul.mubr.msk.f32.vlgmr.msra.gmra.mxu0 %vm29_vm0, %v24_v6 }
  0xca   :  { %v155_v8 = vpop.f32.mrf.mxu0 }
  0xcb   :  { %v112_v10 = vadd.f32 %v155_v8, %v22_v7 }
  0xcc   :  { %v102_v11 = vpop.f32.mrf.mxu0 }
  0xcd   :  { %115 = vst.msk [vmem:[#allocation2 + $0x8] sm:$0xff] %vm18_vm1, %v112_v10  ;;  %v111_v12 = vadd.f32 %v102_v11, %v21_v9 }
  0xcf   :  { %114 = vst.msk [vmem:[#allocation2] sm:$0xff] %vm18_vm1, %v111_v12 }
  0xd4   :  { %v120_v14 = vld [vmem:[#allocation2 + $0x8] sm:$0xff] }
  0xd5   :  { %v129_v15 = vadd.f32 %v138_v13, %v120_v14 }
  0xd6   :  { %v119_v16 = vld [vmem:[#allocation2] sm:$0xff] }
  0xd7   :  { %131 = vst.msk [vmem:[%s216_s3 + $0x8] sm:$0xff] %vm18_vm1, %v129_v15  ;;  %v128_v17 = vadd.f32 %v138_v13, %v119_v16 }
  0xd9   :  { %130 = vst.msk [vmem:[%s216_s3] sm:$0xff] %vm18_vm1, %v128_v17 }

// kernel: sparse_mha_forward.6
= control target key start
LH: loop header
LB: loop body
LE: loop exit
PB: predicated region body
PF: predicated region fallthrough
CT: control target
= control target key end

     0   :  { %s1125_s0 = inlined_call_operand.vmem [shape: s32[2,2], index: 0, kind: input, shape index: {}]   ;;  %s1126_s2 = inlined_call_operand.vmem [shape: bf16[2,12,8,16], index: 2, kind: input, shape index: {}, may-alias: {2,3,4}]   ;;  %s1127_s3 = inlined_call_operand.vmem [shape: bf16[2,12,8,16], index: 3, kind: input, shape index: {}, may-alias: {2,3,4}]   ;;  %s1128_s4 = inlined_call_operand.vmem [shape: bf16[2,12,8,16], index: 4, kind: input, shape index: {}, may-alias: {2,3,4}]   ;;  %s1129_s5 = inlined_call_operand.vmem [shape: f32[2,2,8,16], index: 5, kind: output, shape index: {}]   ;;  %s1130_s1 = inlined_call_operand.vmem [shape: f32[2,2], index: 1, kind: input, shape index: {}]  }
   0x1   :  { %s10_s20 = sshll.u32 %s1125_s0, 4  ;;  %s14_s23 = sshll.u32 %s1130_s1, 4  ;;  %s11_s20 = int_to_ptr.vmem [resolvable:$true] %s10_s20  ;;  %s15_s23 = int_to_ptr.vmem [resolvable:$true] %s14_s23 }
   0x2   :  { %s922_s24 = scalar_lea.vmem %s11_s20, 32  ;;  %p927_p1 = scmp.lt.s32.totalorder %s11_s20, %s11_s20 }
   0x3   :  { %p923_p0 = scmp.ne.s32.totalorder %s11_s20, %s922_s24  ;;  %p928_p2 = scmp.lt.s32.totalorder %s922_s24, %s922_s24 }
   0x5   :  { %p929_p3 = por %p928_p2, %p927_p1 }
   0x7   :  { %p930_p4 = pnand %p929_p3, %p923_p0 }
   0x9   :  { %933 = shalt.err (!%p930_p4)  }
   0xa   :  { %s988_s25 = smov [#allocation6]   ;;  %s934_s26 = scalar_lea.vmem %s15_s23, 32 }
   0xb   :  { %13 = dma.vmem_to_smem %s11_s20, 32, %s988_s25, [#allocation5] }
   0xc   :  { %p935_p5 = scmp.ne.s32.totalorder %s15_s23, %s934_s26  ;;  %p939_p6 = scmp.lt.s32.totalorder %s15_s23, %s15_s23 }
   0xd   :  { %p940_p7 = scmp.lt.s32.totalorder %s934_s26, %s934_s26 }
   0xf   :  { %p941_p8 = por %p940_p7, %p939_p6 }
  0x11   :  { %p942_p9 = pnand %p941_p8, %p935_p5 }
  0x13   :  { %945 = shalt.err (!%p942_p9)  }
  0x14   :  { %s989_s0 = smov [#allocation7]  }
  0x15   :  { %17 = dma.vmem_to_smem %s15_s23, 32, %s989_s0, [#allocation5] }
  0x16   :  { %966 = dma.done.wait [#allocation5], 64 }
  0x17   :  { %967 = vsyncadd [#allocation5], 4294967232 }
  0x18   :  { %19 = sfence }
  0x19   :  { %s1030_s1 = smov 0   ;;  %s1032_s27 = smov 0  }
  0x1a   :  { %s1034_s28 = smov 0   ;;  %s1036_s29 = smov 0  }
  0x1b   :  { %s1038_s30 = smov 0  }
  0x1c LB: > { %s47_s6 = sadd.s32 1, %s978_s28  ;;  %s51_s7 = sadd.s32 1, %s982_s29  ;;  %s986_s30 = sphi %s1038_s30, %s25_s30   ;;  %s982_s29 = sphi %s1036_s29, %s1134_s29   ;;  %s978_s28 = sphi %s1034_s28, %s1133_s28   ;;  %s974_s27 = sphi %s1032_s27, %s1132_s27   ;;  %s970_s1 = sphi %s1030_s1, %s1131_s1  }
  0x1d   : > { %p49_p10 = scmp.ge.s32.totalorder %s47_s6, 2  ;;  %p837_p11 = scmp.ge.s32.totalorder %s986_s30, 1 }
  0x1e   : > { %p333_p12 = scmp.lt.s32.totalorder %s986_s30, 5 }
  0x1f   : > { %s1136_s6 = smov (%p49_p10, %s47_s6), 0  ;;  %s1138_s7 = smov (!%p49_p10, %s51_s7), %s982_s29 }
  0x20   : > { %p334_p13 = pnand %p837_p11, %p333_p12  ;;  %p53_p0 = scmp.ge.s32.totalorder %s1138_s7, 2 }
  0x21   : > { %s417_s8 = sshra.s32 (!%p334_p13), %s970_s1, 7  ;;  %s422_s9 = sand.u32 (!%p334_p13), 127, %s970_s1 }
  0x22   : > { %s1140_s7 = smov (%p53_p0, %s1138_s7), 0  ;;  %337 = sbr.rel (%p334_p13) target bundleno = 830 (0x33e), region = 32 }
  0x23   : > { %s419_s10 = sadd.s32 (!%p334_p13), %s974_s27, %s417_s8  ;;  %p425_p1 = scmp.lt.s32.totalorder (!%p334_p13), %s974_s27, 1 }
  0x24   : > { %s838_s11 = sshll.u32 (!%p334_p13), %s419_s10, 7  ;;  %p504_p5 = scmp.lt.s32.totalorder (!%p334_p13), %s970_s1, 1 }
  0x25   : > { %s1068_s12 = sadd.s32 (!%p334_p13), %s838_s11, %s422_s9 }
  0x26   : > { %s451_s13 = sld [smem:[#allocation6 + %s1068_s12]] (!%p334_p13) }
  0x27   : > { %vm521_vm0 = vcmask 130048   ;;  %v990_v0 = vmov 0.0   ;;  %vm991_vm1 = vmmov 0   ;;  %s424_s14 = sld [smem:[#allocation6 + %s1068_s12]]  ;;  %s1142_s27 = smov (!%p425_p1, %s974_s27), 1  ;;  %vm518_vm2 = vcmask 7168  }
  0x28   : > { %855 = vmatprep.subr.bf16.mxu0 %v990_v0  ;;  %522 = vst.msk [vmem:[#allocation4] sm:$0xff] %vm521_vm0, %v990_v0  ;;  %857 = vmatprep.mubr.msk.bf16.mxu0 %vm991_vm1, %v990_v0  ;;  %s1077_s15 = smul.u32 12, %s1142_s27  ;;  %v992_v4 = vmov -inf   ;;  %vm574_vm3 = vcmask 64512   ;;  %v993_v11 = vmov 0   ;;  %s480_s0 = sld [smem:[#allocation6 + %s1068_s12]] }
  0x29   : > { %861 = vmatprep.subr.bf16.mxu1 %v990_v0  ;;  %863 = vmatprep.mubr.msk.bf16.mxu1 %vm991_vm1, %v990_v0  ;;  %519 = vst.msk [vmem:[#allocation2] sm:$0xff] %vm518_vm2, %v992_v4  ;;  %520 = vst.msk [vmem:[#allocation3] sm:$0xff] %vm518_vm2, %v990_v0  ;;  %vm610_vm4 = vcmask 1043456   ;;  %s1150_s1 = smov (!%p504_p5, %s970_s1), 1 }
  0x2a   : > { %914 = vset.pattern.permute.xlu0 %v993_v11  ;;  %915 = vset.pattern.permute.xlu1 %v993_v11 }
  0x2c   : > { %s452_s16 = sadd.s32 4, %s451_s13 }
  0x2d   : > { %p455_p2 = scmp.lt.s32.totalorder %s452_s16, 11  ;;  %p427_p3 = scmp.lt.s32.totalorder %s424_s14, 11 }
  0x2e   : > { %s481_s8 = sadd.s32 8, %s480_s0 }
  0x2f   : > { %s1144_s16 = smov (!%p455_p2, %s452_s16), 11  ;;  %s1146_s14 = smov (!%p427_p3, %s424_s14), 11  ;;  %v598_v34 = vld [vmem:[#allocation4] sm:$0xff] }
  0x30   : > { %s461_s17 = sadd.s32 %s1077_s15, %s1144_s16  ;;  %s433_s19 = sadd.s32 %s1077_s15, %s1146_s14  ;;  %v573_v12 = vld [vmem:[#allocation2] sm:$0xff]  ;;  %v590_v26 = vld [vmem:[#allocation3] sm:$0xff] }
  0x31   : > { %s841_s18 = sshll.u32 %s461_s17, 2  ;;  %s839_s23 = sshll.u32 %s433_s19, 2 }
  0x32   : > { %s463_s22 = scalar_lea.vmem %s1127_s3, %s841_s18  ;;  %s435_s26 = scalar_lea.vmem %s1126_s2, %s839_s23 }
  0x33   : > { %v524_v1 = vld [vmem:[%s463_s22] sm:$0xf]  ;;  %p484_p4 = scmp.lt.s32.totalorder %s481_s8, 11  ;;  %s844_s16 = sshll.u32 %s1142_s27, 1 }
  0x34   : > { %v530_v2 = vsel %vm521_vm0, %v524_v1, 0  ;;  %v523_v3 = vld [vmem:[%s435_s26] sm:$0xf]  ;;  %s510_s17 = sadd.s32 %s844_s16, %s1150_s1 }
  0x35   : > { %856 = vmatpush3.bf16.xpose.msra.mxu0 %v530_v2  ;;  %s1148_s8 = smov (!%p484_p4, %s481_s8), 11 }
  0x36   : > { %s490_s9 = sadd.s32 %s1077_s15, %s1148_s8  ;;  %s667_s15 = sld [smem:[#allocation7 + %s1068_s12]] }
  0x37   : > { %s843_s10 = sshll.u32 %s490_s9, 2  ;;  %s845_s12 = sshll.u32 %s510_s17, 3 }
  0x38   : > { %s492_s14 = scalar_lea.vmem %s1128_s4, %s843_s10  ;;  %s512_s20 = scalar_lea.vmem %s1129_s5, %s845_s12 }
  0x39   : > { %v606_v16 = vld [vmem:[%s492_s14] sm:$0xf] }
  0x3a   : > { %v612_v17 = vsel %vm610_vm4, %v606_v16, 0 }
  0x3b   : > { %862 = vmatpush3.bf16.msra.mxu1 %v612_v17 }
  0x3c   : > { %858 = vmatmul.mubr.msk.bf16.vlgmr.msra.gmra.mxu0 %vm521_vm0, %v523_v3  ;;  %v670_v31 = vstv %s667_s15 }
  0xfc   : > { %v566_v5 = vpop.f32.mrf.mxu0 }
  0xfd   : > { %v572_v6 = vmul.f32 0.25, %v566_v5 }
  0xfe   : > { %v859_v7 = vpop.f32.mrf.mxu0 }
  0xff   : > { %v575_v8 = vsel %vm574_vm3, %v572_v6, -inf }
 0x100   : > { %576 = vmax.xlane.f32.xlu0 %v575_v8  ;;  %v569_v9 = vpop.f32.mrf.mxu0 }
 0x102   : > { %v860_v10 = vpop.f32.mrf.mxu0 }
 0x189   : > { %v577_v13 = vpop.xlane.xlu0 %576 }
 0x18a   : > { %v578_v14 = vmax.f32 %v573_v12, %v577_v13 }
 0x18c   : > { %v579_v15 = vsub.f32 %v573_v12, %v578_v14  ;;  %656 = vst.msk [vmem:[#allocation2] sm:$0xff] %vm518_vm2, %v578_v14  ;;  %584 = vperm.xlu0 %914, %v578_v14  }
 0x18e   : > { %v580_v22 = vmul.f32 1.442695, %v579_v15 }
 0x207   : > { %v585_v18 = vpop.permute.xlu0 %584 }
 0x208   : > { %v587_v19 = vsub.f32 %v572_v6, %v585_v18 }
 0x20a   : > { %v588_v20 = vmul.f32 1.442695, %v587_v19 }
 0x20c   : > { %916 = vpow2.f32 %v588_v20 }
 0x20d   : > { %918 = vpow2.f32 %v580_v22 }
 0x219   : > { %v917_v21 = vpop.eup %916 }
 0x21a   : > { %v592_v23 = vsel %vm574_vm3, %v917_v21, 0.0  ;;  %v605_v24 = vpack.c.bf16 %v917_v21, %v917_v21  ;;  %v919_v25 = vpop.eup %918 }
 0x21b   : > { %593 = vadd.xlane.f32.xlu1 %v592_v23  ;;  %v591_v27 = vmul.f32 %v919_v25, %v590_v26 }
 0x21c   : > { %864 = vmatmul.mubr.msk.bf16.vlgmr.msra.gmra.mxu1 %vm574_vm3, %v605_v24 }
 0x22c   : > { %601 = vperm.xlu1 %915, %v919_v25  }
 0x2a4   : > { %v594_v28 = vpop.xlane.xlu1 %593 }
 0x2a5   : > { %v595_v29 = vadd.f32 %v594_v28, %v591_v27 }
 0x2a7   : > { %597 = vst.msk [vmem:[#allocation3] sm:$0xff] %vm518_vm2, %v595_v29 }
 0x2a8   : > { %v602_v35 = vpop.permute.xlu1 %601 }
 0x2a9   : > { %v604_v36 = vmul.f32 %v602_v35, %v598_v34 }
 0x2ae   : > { %v668_v30 = vld [vmem:[#allocation3] sm:$0xff] }
 0x2af   : > { %920 = vrcp.f32 %v668_v30 }
 0x2bc   : > { %v921_v32 = vpop.eup %920 }
 0x2bd   : > { %v671_v33 = vmul.f32 %v921_v32, %v670_v31 }
 0x2bf   : > { %675 = vperm.xlu1 %915, %v671_v33  }
 0x2dc   : > { %v648_v37 = vpop.f32.mrf.mxu1 }
 0x2dd   : > { %v654_v38 = vadd.f32 %v648_v37, %v604_v36 }
 0x2de   : > { %v865_v39 = vpop.f32.mrf.mxu1 }
 0x2df   : > { %655 = vst.msk [vmem:[#allocation4] sm:$0xff] %vm521_vm0, %v654_v38 }
 0x2e0   : > { %v651_v40 = vpop.f32.mrf.mxu1 }
 0x2e2   : > { %v866_v41 = vpop.f32.mrf.mxu1 }
 0x2e6   : > { %v672_v42 = vld [vmem:[#allocation4] sm:$0xff] }
 0x33a   : > { %v676_v43 = vpop.permute.xlu1 %675 }
 0x33b   : > { %v678_v44 = vmul.f32 %v676_v43, %v672_v42 }
 0x33d   : > { %679 = vst.msk [vmem:[%s512_s20] sm:$0xff] %vm521_vm0, %v678_v44 }
 0x33e PF: > { %s25_s30 = sadd.s32 1, %s986_s30   ;;  %s1131_s1 = smov %s978_s28 }
 0x33f   : > { %p22_p6 = scmp.ge.s32.totalorder %s25_s30, 6   ;;  %s1132_s27 = smov %s982_s29 }
 0x340   : > { %s1133_s28 = smov %s1136_s6  ;;  %s1134_s29 = smov %s1140_s7 }
 0x341   :  { %24 = sbr.rel (!%p22_p6) target bundleno = 28 (0x1c), region = 76 }

// kernel: sparse_mha_forward.7
= control target key start
LH: loop header
LB: loop body
LE: loop exit
PB: predicated region body
PF: predicated region fallthrough
CT: control target
= control target key end

     0   :  { %v175_v1 = vmov 0.0   ;;  %vm176_vm0 = vmmov 0   ;;  %vm20_vm1 = vcmask 261120   ;;  %s222_s0 = inlined_call_operand.vmem [shape: bf16[16,32], index: 0, kind: input, shape index: {}]   ;;  %s223_s1 = inlined_call_operand.vmem [shape: bf16[32,32], index: 1, kind: input, shape index: {}]   ;;  %s224_s2 = inlined_call_operand.vmem [shape: f32[1,32], index: 2, kind: input, shape index: {}]   ;;  %s225_s3 = inlined_call_operand.hbm [shape: f32[16,32], index: 3, kind: output, shape index: {}]  }
   0x1   :  { %v150_v0 = vld [vmem:[%s223_s1 + $0x8] sm:$0xff]   ;;  %137 = vmatprep.subr.bf16.mxu0 %v175_v1  ;;  %v151_v2 = vld [vmem:[%s223_s1] sm:$0xff]   ;;  %141 = vmatprep.mubr.msk.bf16.mxu0 %vm176_vm0, %v175_v1  ;;  %21 = vst.msk [vmem:[#allocation2] sm:$0xff] %vm20_vm1, %v175_v1  ;;  %22 = vst.msk [vmem:[#allocation2 + $0x8] sm:$0xff] %vm20_vm1, %v175_v1 }
   0x2   :  { %138 = vmatpush3.bf16.msra.mxu0 %v150_v0 }
   0x3   :  { %139 = vmatprep.subr.bf16.mxu0 %v175_v1 }
   0x4   :  { %8 = vsyncpa [#allocation4], 0  ;;  %v152_v3 = vld [vmem:[%s222_s0] sm:$0xff]   ;;  %s177_s0 = smov [#allocation3]  }
   0x5   :  { %v133_v12 = vld [vmem:[%s224_s2] ss:$0 sm:$0xff]  ;;  %s118_s19 = sshll.u32 %s177_s0, 4  ;;  %s119_s19 = int_to_ptr.vmem [resolvable:$true] %s118_s19 }
   0x6   :  { %140 = vmatpush3.bf16.msra.mxu0 %v151_v2  ;;  %s153_s20 = scalar_lea.vmem %s119_s19, 256  ;;  %p158_p1 = scmp.lt.s32.totalorder %s119_s19, %s119_s19 }
   0x7   :  { %p154_p0 = scmp.ne.s32.totalorder %s119_s19, %s153_s20  ;;  %p159_p2 = scmp.lt.s32.totalorder %s153_s20, %s153_s20 }
   0x8   :  { %v23_v4 = vld [vmem:[#allocation2] sm:$0xff]  ;;  %v24_v8 = vld [vmem:[#allocation2 + $0x8] sm:$0xff] }
   0x9   :  { %142 = vmatmul.mubr.msk.bf16.vlgmr.msra.gmra.mxu0 %vm20_vm1, %v152_v3  ;;  %p160_p3 = por %p159_p2, %p158_p1 }
   0xb   :  { %p161_p4 = pnand %p160_p3, %p154_p0 }
  0xc9   :  { %v86_v5 = vpop.f32.mrf.mxu0 }
  0xca   :  { %v93_v6 = vadd.f32 %v86_v5, %v23_v4 }
  0xcb   :  { %v143_v7 = vpop.f32.mrf.mxu0 }
  0xcc   :  { %95 = vst.msk [vmem:[#allocation2] sm:$0xff] %vm20_vm1, %v93_v6 }
  0xcd   :  { %v89_v9 = vpop.f32.mrf.mxu0 }
  0xce   :  { %v94_v10 = vadd.f32 %v89_v9, %v24_v8 }
  0xcf   :  { %v144_v11 = vpop.f32.mrf.mxu0 }
  0xd0   :  { %96 = vst.msk [vmem:[#allocation2 + $0x8] sm:$0xff] %vm20_vm1, %v94_v10 }
  0xd3   :  { %v100_v13 = vld [vmem:[#allocation2] sm:$0xff] }
  0xd4   :  { %v109_v14 = vadd.f32 %v133_v12, %v100_v13 }
  0xd6   :  { %111 = vst.msk [vmem:[#allocation3] sm:$0xff] %vm20_vm1, %v109_v14 }
  0xd7   :  { %v101_v15 = vld [vmem:[#allocation2 + $0x8] sm:$0xff] }
  0xd8   :  { %v110_v16 = vadd.f32 %v133_v12, %v101_v15 }
  0xda   :  { %112 = vst.msk [vmem:[#allocation3 + $0x8] sm:$0xff] %vm20_vm1, %v110_v16 }
  0xdb   :  { %164 = shalt.err (!%p161_p4)
}
  0xdc   :  { %s178_s21 = smov 128   ;;  %s179_s2 = smov 8  }
  0xdd   :  { %124 = dma.vmem_to_hbm [thread:$0]  %s119_s19, 256, %s225_s3, [#allocation4], %s178_s21, %s178_s21, %s179_s2  }
  0xde   :  { %173 = dma.done.wait [#allocation4], 256  }
  0xdf   :  { %174 = vsyncadd [#allocation4], 4294967040 }
  0xe0   :  { %128 = vsyncpa [#allocation4], 1 }

</bundles_post_ra>
